<compile_context>
chip_gen: v7x
topology: tpu7x:2x2x1
jax: 0.10.0
libtpu: 0.0.40
codegen_flags: <defaults>
</compile_context>

<pallas_src>
import functools

import jax
import jax.numpy as jnp
from jax import lax
from jax.experimental import pallas as pl
from jax.experimental.pallas import tpu as pltpu

LN_EPS = 1e-5
DMA_DEPTH = 16                      # in-flight row DMAs (HBM-gather fallback)
_VMEM_BUDGET = 14 * 1024 * 1024     # conservative: under v5e's 16 MiB scoped default
_BLOCK_BUDGET = 8 * 1024 * 1024     # emb scratch + double-buffered output block


def _round_up(x, m):
    return (x + m - 1) // m * m


def _layernorm_block(emb_raw, gamma, beta, h_real):
    """Two-pass LayerNorm over the lane axis, masked past the real hidden dim."""
    emb = emb_raw.astype(jnp.float32)                       # (TB, Hp)
    inv_h = 1.0 / float(h_real)
    lane = lax.broadcasted_iota(jnp.int32, emb.shape, emb.ndim - 1)
    valid = lane < h_real
    mean = jnp.sum(emb, axis=-1, keepdims=True) * inv_h     # padded lanes are 0
    diff = jnp.where(valid, emb - mean, 0.0)
    var = jnp.sum(diff * diff, axis=-1, keepdims=True) * inv_h
    normed = diff * lax.rsqrt(var + LN_EPS)                 # EUP slot
    # gamma/beta are zero-padded past h_real -> padded output lanes are 0.
    return normed * gamma + beta


def _resident_kernel(ids_ref, table_ref, gamma_ref, beta_ref, out_ref,
                     emb_vmem, *, tb, h_real):
    """Gather TB rows from a VMEM-resident table, then LayerNorm the block.

    ids_ref   : (Np,)    int32  all (padded) token ids, SMEM (scalar prefetch)
    table_ref : (Vp, Hp) table in VMEM (constant index_map -> fetched once)
    gamma_ref : (1, Hp)  LN weight (zero-padded past real H)
    beta_ref  : (1, Hp)  LN bias   (zero-padded past real H)
    out_ref   : (TB, Hp) lane-dense output block
    emb_vmem  : (TB, Hp) gathered rows scratch (table dtype)
    """
    base = pl.program_id(0) * tb

    @pl.loop(0, tb)
    def _(t):
        tok = ids_ref[base + t]
        emb_vmem[pl.ds(t, 1), :] = table_ref[pl.ds(tok, 1), :]

    out_ref[...] = _layernorm_block(
        emb_vmem[...], gamma_ref[...], beta_ref[...], h_real
    ).astype(out_ref.dtype)


def _hbm_gather_kernel(ids_ref, table_hbm, gamma_ref, beta_ref, out_ref,
                       emb_vmem, sems, *, tb, h_real):
    """Fallback for tables that do not fit VMEM: per-row DMA gather from HBM."""
    base = pl.program_id(0) * tb
    depth = min(DMA_DEPTH, tb)

    def start_row(t, tok):
        pltpu.make_async_copy(
            table_hbm.at[pl.ds(tok, 1), :],
            emb_vmem.at[pl.ds(t, 1), :],
            sems.at[t % DMA_DEPTH],
        ).start()

    def wait_row(t):
        # src index irrelevant for the wait; shape/bytes must match.
        pltpu.make_async_copy(
            table_hbm.at[pl.ds(0, 1), :],
            emb_vmem.at[pl.ds(t, 1), :],
            sems.at[t % DMA_DEPTH],
        ).wait()

    # Prime up to `depth` in-flight row gathers.
    @pl.loop(0, depth)
    def _(t):
        start_row(t, ids_ref[base + t])

    # Steady state: read the SMEM id *before* the wait (wait breaks sst->sld
    # forwarding), then reuse the freed semaphore slot.
    if tb > depth:
        @pl.loop(depth, tb)
        def _(t):
            tok = ids_ref[base + t]
            wait_row(t - depth)
            start_row(t, tok)

    # Drain the tail.
    @pl.loop(tb - depth, tb)
    def _(t):
        wait_row(t)

    # TODO(synk): overlap LN of completed sub-chunks with the remaining row
    # DMAs (chunked double-buffering) in this fallback path.
    out_ref[...] = _layernorm_block(
        emb_vmem[...], gamma_ref[...], beta_ref[...], h_real
    ).astype(out_ref.dtype)


def prepare_decoder_embeddings(word_emb, ln_gamma, ln_beta, *,
                               table_dtype=jnp.float32):
    """One-time weight preprocessing (pad/cast hoisted out of the forward)."""
    V, H = word_emb.shape
    Hp = _round_up(H, 128)          # lane-dense rows / output
    Vp = _round_up(V, 8)            # sublane-aligned table
    table = jnp.pad(word_emb.astype(table_dtype), ((0, Vp - V), (0, Hp - H)))
    gamma = jnp.pad(ln_gamma.astype(jnp.float32), (0, Hp - H)).reshape(1, Hp)
    beta = jnp.pad(ln_beta.astype(jnp.float32), (0, Hp - H)).reshape(1, Hp)
    return {"table": table, "gamma": gamma, "beta": beta,
            "vocab": V, "hidden": H}


def decoder_embeddings_forward(x, params, *, token_block=256,
                               out_dtype=jnp.float32, force_hbm_gather=False):
    """x: (B, S) int token ids -> (B, S, H) LayerNormed embeddings."""
    table, gamma, beta = params["table"], params["gamma"], params["beta"]
    V, H = params["vocab"], params["hidden"]
    Vp, Hp = table.shape
    B, S = x.shape
    N = B * S

    table_bytes = Vp * Hp * table.dtype.itemsize
    out_itemsize = jnp.dtype(out_dtype).itemsize
    row_bytes = Hp * (table.dtype.itemsize + 2 * out_itemsize)

    # Token block: amortize per-grid-step overhead, keep >= 2 grid steps for
    # small N (v7x has 2 TCs), respect a conservative per-block VMEM budget.
    tb = min(token_block, _round_up(N, 8))
    if N > 8:
        tb = min(tb, _round_up((N + 1) // 2, 8))
    tb = min(tb, max(8, (_BLOCK_BUDGET // row_bytes) // 8 * 8))
    tb = max(8, _round_up(tb, 8))
    Np = _round_up(N, tb)

    # NOTE: nn.Embedding raises on out-of-range ids; we clamp instead.
    ids = jnp.clip(x.reshape(N).astype(jnp.int32), 0, V - 1)
    ids = jnp.pad(ids, (0, Np - N))
    # TODO(synk): for very long sequences prefetch per-block ids instead of the
    # whole id vector (1-D SMEM arrays pad to next_pow2(4*Np) bytes).

    block_bytes = tb * Hp * (table.dtype.itemsize + 2 * out_itemsize)
    resident = (not force_hbm_gather) and (
        2 * table_bytes + block_bytes + 64 * 1024 <= _VMEM_BUDGET)

    if resident:
        kernel = functools.partial(_resident_kernel, tb=tb, h_real=H)
        in_specs = [
            pl.BlockSpec((Vp, Hp), lambda i, ids_sref: (0, 0)),  # whole table
            pl.BlockSpec((1, Hp), lambda i, ids_sref: (0, 0)),   # LN gamma
            pl.BlockSpec((1, Hp), lambda i, ids_sref: (0, 0)),   # LN beta
        ]
        scratch = [pltpu.VMEM((tb, Hp), table.dtype)]
    else:
        kernel = functools.partial(_hbm_gather_kernel, tb=tb, h_real=H)
        in_specs = [
            pl.BlockSpec(memory_space=pl.ANY),                   # table in HBM
            pl.BlockSpec((1, Hp), lambda i, ids_sref: (0, 0)),
            pl.BlockSpec((1, Hp), lambda i, ids_sref: (0, 0)),
        ]
        scratch = [pltpu.VMEM((tb, Hp), table.dtype),
                   pltpu.SemaphoreType.DMA((DMA_DEPTH,))]

    out_flat = pl.pallas_call(
        kernel,
        out_shape=jax.ShapeDtypeStruct((Np, Hp), out_dtype),
        grid_spec=pltpu.PrefetchScalarGridSpec(
            num_scalar_prefetch=1,             # ids -> SMEM, drive the gather
            grid=(Np // tb,),
            in_specs=in_specs,
            out_specs=pl.BlockSpec((tb, Hp), lambda i, ids_sref: (i, 0)),
            scratch_shapes=scratch,
        ),
        compiler_params=pltpu.CompilerParams(
            dimension_semantics=("parallel",),
        ),
    )(ids, table, gamma, beta)

    return out_flat[:N, :H].reshape(B, S, H)


def reference_forward(x, word_emb, ln_gamma, ln_beta):
    emb = word_emb[x]                                    # (B, S, H)
    mean = jnp.mean(emb, axis=-1, keepdims=True)
    var = jnp.mean((emb - mean) ** 2, axis=-1, keepdims=True)
    normed = (emb - mean) / jnp.sqrt(var + LN_EPS)
    return normed * ln_gamma + ln_beta


if __name__ == "__main__":
    # Small shapes consistent with the module's forward.
    vocab_size = 16
    hidden_dim = 32
    max_position_embeddings = 64   # declared but unused in forward (parity)
    batch, seq = 2, 8

    key = jax.random.PRNGKey(0)
    k_w, k_p, k_g, k_b, k_x = jax.random.split(key, 5)

    # nn.Embedding default init: N(0, 1).
    word_emb = jax.random.normal(k_w, (vocab_size, hidden_dim), jnp.float32)
    pos_emb = jax.random.normal(k_p, (max_position_embeddings, hidden_dim),
                                jnp.float32)   # unused in forward (parity)
    # Non-trivial LN affine to exercise the gamma/beta path.
    ln_gamma = 1.0 + 0.1 * jax.random.normal(k_g, (hidden_dim,), jnp.float32)
    ln_beta = 0.1 * jax.random.normal(k_b, (hidden_dim,), jnp.float32)

    x = jax.random.randint(k_x, (batch, seq), 0, vocab_size, jnp.int32)

    params = prepare_decoder_embeddings(word_emb, ln_gamma, ln_beta)
    ref = reference_forward(x, word_emb, ln_gamma, ln_beta)

    # Fast path: VMEM-resident table gather.
    out = decoder_embeddings_forward(x, params)
    out = jax.block_until_ready(out)
    assert out.shape == (batch, seq, hidden_dim)
    assert jnp.allclose(out, ref, atol=1e-4, rtol=1e-4)

    # Fallback path: HBM-resident table, per-row DMA gather.
    out_hbm = decoder_embeddings_forward(x, params, force_hbm_gather=True)
    out_hbm = jax.block_until_ready(out_hbm)
    assert jnp.allclose(out_hbm, ref, atol=1e-4, rtol=1e-4)

    # TODO(synk): training-mode dropout (pltpu.prng_seed + stateful_bernoulli)
    # is not implemented; forward here matches eval-mode (identity dropout).
    print("KERNEL_OK")
</pallas_src>

<mosaic_0001>
module attributes {stable_mosaic.version = 11 : i64} {
  func.func @_resident_kernel(%arg0: i32, %arg1: memref<16xi32, #tpu.memory_space<smem>>, %arg2: memref<16x128xf32, #tpu.memory_space<vmem>>, %arg3: memref<1x128xf32, #tpu.memory_space<vmem>>, %arg4: memref<1x128xf32, #tpu.memory_space<vmem>>, %arg5: memref<8x128xf32, #tpu.memory_space<vmem>>, %arg6: memref<8x128xf32, #tpu.memory_space<vmem>>) attributes {dimension_semantics = [#tpu.dimension_semantics<parallel>], iteration_bounds = array<i64: 2>, scalar_prefetch = 1 : i64, scratch_operands = 1 : i64, tpu.core_type = #tpu.core_type<tc>, window_params = [{pipeline_mode = #tpu.pipeline_mode<synchronous>, transform_indices = @transform_0, window_bounds = array<i64: 16, 128>}, {pipeline_mode = #tpu.pipeline_mode<synchronous>, transform_indices = @transform_1, window_bounds = array<i64: 1, 128>}, {pipeline_mode = #tpu.pipeline_mode<synchronous>, transform_indices = @transform_2, window_bounds = array<i64: 1, 128>}, {transform_indices = @transform_3, window_bounds = array<i64: 8, 128>}]} {
    %c8_i32 = arith.constant 8 : i32
    %0 = arith.muli %arg0, %c8_i32 : i32
    %c0_i32 = arith.constant 0 : i32
    %c8_i32_0 = arith.constant 8 : i32
    %1 = arith.addi %c0_i32, %c8_i32_0 : i32
    %c1_i32 = arith.constant 1 : i32
    scf.for %arg7 = %c0_i32 to %1 step %c1_i32  : i32 {
      %c1_i32_14 = arith.constant 1 : i32
      %31 = arith.muli %arg7, %c1_i32_14 : i32
      %c0_i32_15 = arith.constant 0 : i32
      %32 = arith.addi %c0_i32_15, %31 : i32
      %33 = arith.addi %0, %32 : i32
      %34 = arith.index_cast %33 : i32 to index
      %35 = memref.load %arg1[%34] : memref<16xi32, #tpu.memory_space<smem>>
      %36 = arith.index_cast %35 : i32 to index
      %c0_16 = arith.constant 0 : index
      %37 = vector.load %arg2[%36, %c0_16] : memref<16x128xf32, #tpu.memory_space<vmem>>, vector<1x128xf32>
      %38 = arith.index_cast %32 : i32 to index
      %c0_17 = arith.constant 0 : index
      %39 = vector.load %arg6[%38, %c0_17] : memref<8x128xf32, #tpu.memory_space<vmem>>, vector<1x128xf32>
      tpu.vector_store %arg6[%38, %c0_17], %37 {strides = array<i32>} : memref<8x128xf32, #tpu.memory_space<vmem>>, vector<1x128xf32>,
    }
    %c8_i32_1 = arith.constant 8 : i32
    %c0 = arith.constant 0 : index
    %c0_2 = arith.constant 0 : index
    %2 = vector.load %arg6[%c0, %c0_2] : memref<8x128xf32, #tpu.memory_space<vmem>>, vector<8x128xf32>
    %c0_3 = arith.constant 0 : index
    %c0_4 = arith.constant 0 : index
    %3 = vector.load %arg3[%c0_3, %c0_4] : memref<1x128xf32, #tpu.memory_space<vmem>>, vector<1x128xf32>
    %c0_5 = arith.constant 0 : index
    %c0_6 = arith.constant 0 : index
    %4 = vector.load %arg4[%c0_5, %c0_6] : memref<1x128xf32, #tpu.memory_space<vmem>>, vector<1x128xf32>
    %5 = tpu.iota {dimensions = array<i32: 1>} : vector<8x128xi32>
    %c32_i32 = arith.constant 32 : i32
    %6 = vector.broadcast %c32_i32 : i32 to vector<8x128xi32>
    %7 = arith.cmpi slt, %5, %6 : vector<8x128xi32>
    %cst = arith.constant dense<0.000000e+00> : vector<8xf32>
    %8 = vector.multi_reduction <add>, %2, %cst [1] : vector<8x128xf32> to vector<8xf32>
    %9 = vector.shape_cast %8 : vector<8xf32> to vector<8x1xf32>
    %cst_7 = arith.constant 3.125000e-02 : f32
    %10 = vector.broadcast %cst_7 : f32 to vector<8x1xf32>
    %11 = arith.mulf %9, %10 : vector<8x1xf32>
    %12 = vector.broadcast %11 : vector<8x1xf32> to vector<8x128xf32>
    %13 = arith.subf %2, %12 : vector<8x128xf32>
    %cst_8 = arith.constant 0.000000e+00 : f32
    %14 = vector.broadcast %cst_8 : f32 to vector<8x128xf32>
    %15 = arith.select %7, %13, %14 : vector<8x128xi1>, vector<8x128xf32>
    %16 = arith.mulf %15, %15 : vector<8x128xf32>
    %cst_9 = arith.constant dense<0.000000e+00> : vector<8xf32>
    %17 = vector.multi_reduction <add>, %16, %cst_9 [1] : vector<8x128xf32> to vector<8xf32>
    %18 = vector.shape_cast %17 : vector<8xf32> to vector<8x1xf32>
    %cst_10 = arith.constant 3.125000e-02 : f32
    %19 = vector.broadcast %cst_10 : f32 to vector<8x1xf32>
    %20 = arith.mulf %18, %19 : vector<8x1xf32>
    %cst_11 = arith.constant 9.99999974E-6 : f32
    %21 = vector.broadcast %cst_11 : f32 to vector<8x1xf32>
    %22 = arith.addf %20, %21 : vector<8x1xf32>
    %23 = math.rsqrt %22 : vector<8x1xf32>
    %24 = vector.broadcast %23 : vector<8x1xf32> to vector<8x128xf32>
    %25 = arith.mulf %15, %24 : vector<8x128xf32>
    %26 = vector.broadcast %3 : vector<1x128xf32> to vector<8x128xf32>
    %27 = arith.mulf %25, %26 : vector<8x128xf32>
    %28 = vector.broadcast %4 : vector<1x128xf32> to vector<8x128xf32>
    %29 = arith.addf %27, %28 : vector<8x128xf32>
    %c0_12 = arith.constant 0 : index
    %c0_13 = arith.constant 0 : index
    %30 = vector.load %arg5[%c0_12, %c0_13] : memref<8x128xf32, #tpu.memory_space<vmem>>, vector<8x128xf32>
    tpu.vector_store %arg5[%c0_12, %c0_13], %29 {strides = array<i32>} : memref<8x128xf32, #tpu.memory_space<vmem>>, vector<8x128xf32>,
    return
  }
  func.func @transform_0(%arg0: i32, %arg1: memref<16xi32, #tpu.memory_space<smem>>) -> (i32, i32) {
    %c0_i32 = arith.constant 0 : i32
    %c0_i32_0 = arith.constant 0 : i32
    %c0_i32_1 = arith.constant 0 : i32
    return %c0_i32, %c0_i32_0 : i32, i32
  }
  func.func @transform_1(%arg0: i32, %arg1: memref<16xi32, #tpu.memory_space<smem>>) -> (i32, i32) {
    %c0_i32 = arith.constant 0 : i32
    %c0_i32_0 = arith.constant 0 : i32
    %c0_i32_1 = arith.constant 0 : i32
    return %c0_i32, %c0_i32_0 : i32, i32
  }
  func.func @transform_2(%arg0: i32, %arg1: memref<16xi32, #tpu.memory_space<smem>>) -> (i32, i32) {
    %c0_i32 = arith.constant 0 : i32
    %c0_i32_0 = arith.constant 0 : i32
    %c0_i32_1 = arith.constant 0 : i32
    return %c0_i32, %c0_i32_0 : i32, i32
  }
  func.func @transform_3(%arg0: i32, %arg1: memref<16xi32, #tpu.memory_space<smem>>) -> (i32, i32) {
    %c0_i32 = arith.constant 0 : i32
    %c0_i32_0 = arith.constant 0 : i32
    return %arg0, %c0_i32 : i32, i32
  }
}

</mosaic_0001>

<bundles_post_ra>
// kernel: tpu_custom_call.1
= control target key start
LH: loop header
LB: loop body
LE: loop exit
PB: predicated region body
PF: predicated region fallthrough
CT: control target
= control target key end

     0   :  { %s677_s0 = inlined_call_operand.hbm [shape: s32[16], index: 0, kind: input, shape index: {}]   ;;  %s678_s1 = inlined_call_operand.hbm [shape: f32[16,128], index: 1, kind: input, shape index: {}]   ;;  %s679_s2 = inlined_call_operand.vmem [shape: f32[1,128], index: 2, kind: input, shape index: {}]   ;;  %s680_s3 = inlined_call_operand.vmem [shape: f32[1,128], index: 3, kind: input, shape index: {}]   ;;  %s681_s4 = inlined_call_operand.hbm [shape: f32[16,128], index: 4, kind: output, shape index: {}]  }
   0x1   :  { %s371_s17 = scalar_lea.hbm %s677_s0, 16 }
   0x2   :  { %p372_p0 = scmp.ne.s32.totalorder %s677_s0, %s371_s17  ;;  %p375_p1 = scmp.lt.u32.totalorder %s371_s17, %s677_s0 }
   0x4   :  { %p377_p2 = pnand %p375_p1, %p372_p0 }
   0x6   :  { %380 = shalt.err (!%p377_p2)  }
   0x7   :  { %s487_s22 = smov [#allocation4]  }
   0x8   :  { %10 = dma.hbm_to_smem %s677_s0, 16, %s487_s22, [#allocation3] }
   0x9   :  { %457 = dma.done.wait [#allocation3], 16 }
   0xa   :  { %458 = vsyncadd [#allocation3], 4294967280 }
   0xb   :  { %12 = sfence }
   0xc   :  { %13 = vsyncpa [#allocation6], 0 }
   0xd   :  { %14 = vsyncpa [#allocation7], 0 }
   0xe   :  { %16 = vsyncpa [#allocation7 + $0x1], 0  ;;  %s529_s25 = smov 0   ;;  %s531_s26 = smov 0  }
   0xf   :  { %s533_s27 = smov 0   ;;  %s535_s28 = smov 0  }
  0x10 LB: > { %s550_s0 = sadd.s32 4294967295, %s481_s28   ;;  %s295_s29 = sadd.s32 4294967294, %s481_s28   ;;  %s481_s28 = sphi %s535_s28, %s697_s28   ;;  %s477_s27 = sphi %s533_s27, %s696_s27   ;;  %s473_s26 = sphi %s531_s26, %s695_s26   ;;  %s469_s25 = sphi %s529_s25, %s694_s25  }
  0x11   : > { %s554_s30 = sadd.s32 1, %s481_s28   ;;  %s92_s5 = sadd.s32 1, %s477_s27 }
  0x12   : > { %s89_s6 = ssub.s32 %s481_s28, %s554_s30  ;;  %p102_p3 = scmp.ne.s32.totalorder %s477_s27, %s473_s26 }
  0x13   : > { %p90_p4 = scmp.eq.s32.totalorder %s89_s6, 0  ;;  %p103_p5 = scmp.eq.s32.totalorder %s550_s0, 1 }
  0x14   : > { %p108_p6 = scmp.ne.s32.totalorder %s473_s26, %s469_s25  ;;  %p109_p7 = scmp.eq.s32.totalorder %s295_s29, 1 }
  0x15   : > { %s565_s7 = scalar_select %p90_p4, %s477_s27, %s92_s5  }
  0x16   : > { %p567_p8 = por %p103_p5, %p102_p3  ;;  %p571_p9 = por %p109_p7, %p108_p6 }
  0x17   : > { %p296_p10 = scmp.ge.s32.totalorder %s481_s28, 1  ;;  %p116_p11 = scmp.lt.s32.totalorder %s481_s28, 3 }
  0x18   : > { %s685_s8 = scalar_select %p567_p8, 1, 0 }
  0x19   : > { %s686_s9 = scalar_select %p571_p9, 1, 0 }
  0x1a   : > { %p682_p12 = scmp.eq.s32.totalorder %s550_s0, 0  ;;  %p578_p13 = pnand %p296_p10, %p116_p11 }
  0x1b   : > { %s488_s11 = smov [#allocation5]   ;;  %s381_s16 = scalar_lea.hbm %s678_s1, 256 }
  0x1c   : > { %s687_s10 = scalar_select %p578_p13, 1, 0 }
  0x1d   : > { %s128_s12 = sshll.u32 %s488_s11, 4  ;;  %p314_p0 = pneg %p578_p13  ;;  %s129_s12 = int_to_ptr.vmem [resolvable:$true] %s128_s12 }
  0x1e   : > { %p382_p2 = scmp.ne.s32.totalorder %s678_s1, %s381_s16  ;;  %p388_p6 = scmp.lt.u32.totalorder %s381_s16, %s678_s1 }
  0x1f   : > { %p586_p1 = pnand %p682_p12, %p314_p0 }
  0x21   : > { %p383_p3 = pneg %p586_p1 }
  0x23   : > { %p384_p4 = pnand %p383_p3, %p382_p2 }
  0x25   : > { %p385_p5 = pneg %p384_p4 }
  0x27   : > { %p390_p7 = pnand %p388_p6, %p385_p5 }
  0x29   : > { %393 = shalt.err (!%p390_p7)
}
  0x2a   : > { %s394_s21 = scalar_lea.vmem %s129_s12, 256  ;;  %p402_p12 = scmp.lt.s32.totalorder %s129_s12, %s129_s12 }
  0x2b   : > { %p395_p10 = scmp.ne.s32.totalorder %s129_s12, %s394_s21  ;;  %p403_p9 = scmp.lt.s32.totalorder %s394_s21, %s394_s21 }
  0x2d   : > { %p397_p11 = pnand %p395_p10, %p383_p3  ;;  %p404_p8 = por %p403_p9, %p402_p12 }
  0x2f   : > { %p398_p0 = pneg %p397_p11 }
  0x31   : > { %p405_p13 = pnand %p404_p8, %p398_p0 }
  0x33   : > { %408 = shalt.err (!%p405_p13)
}
  0x34   : > { %s489_s22 = smov 128   ;;  %s490_s23 = smov 8  }
  0x35   : > { %317 = dma.hbm_to_vmem [thread:$0]  (!%p586_p1), %s678_s1, 256, %s129_s12, [#allocation6], %s489_s22, %s489_s22, %s490_s23  }
  0x36   : > { %p689_p2 = scmp.ne.s32.totalorder %s687_s10, 0 }
  0x37   : > { %p690_p4 = scmp.eq.s32.totalorder (!%p689_p2), %s550_s0, 0 }
  0x38   : > { %150 = sbr.rel (%p689_p2) target bundleno = 410 (0x19a), region = 32 }
  0x3f   : > { %460 = dma.done.wait (%p690_p4), [#allocation6], 256   ;;  %p691_p3 = pmov %p690_p4 }
  0x40   : > { %s166_s5 = sand.u32 1, %s473_s26   ;;  %s301_s6 = sshll.u32 %s550_s0, 3 }
  0x41   : > { %462 = vsyncadd (%p691_p3), [#allocation6], 4294967040  ;;  %s616_s11 = sshll.u32 %s166_s5, 3  ;;  %s483_s12 = smov 0  }
  0x42   : > { %s168_s13 = scalar_lea.vmem [#allocation8], %s616_s11 }
  0x43 LB: >> { %s176_s10 = sadd.s32 %s485_s12, %s301_s6  ;;  %s180_s16 = scalar_lea.vmem [#allocation2], %s485_s12  ;;  %s485_s12 = sphi %s483_s12, %s175_s12  }
  0x44   : >> { %s177_s14 = sld [smem:[#allocation4 + %s176_s10]]  ;;  %s175_s12 = sadd.s32 1, %s485_s12  }
  0x45   : >> { %p172_p8 = scmp.ge.s32.totalorder %s175_s12, 8  }
  0x46   : > { %v185_v2 = vlaneseq (%p172_p8)  ;;  %v302_v13 = vld [vmem:[%s679_s2] ss:$0 sm:$0xff] (%p172_p8)  ;;  %s305_s21 = sshll.u32 (%p172_p8), %s550_s0, 7  ;;  %s229_s22 = sshll.u32 (%p172_p8), %s168_s13, 4  ;;  %s633_s22 = int_to_ptr.vmem [resolvable:$true] %s229_s22 }
  0x47   : > { %174 = sbr.rel (!%p172_p8) target bundleno = 67 (0x43), region = 78  ;;  %v303_v15 = vld [vmem:[%s680_s3] ss:$0 sm:$0xff] (%p172_p8)  ;;  %s631_s29 = scalar_lea.hbm (%p172_p8), %s681_s4, %s305_s21 }
  0x48   : > { %v186_v3 = vand.u32 (%p172_p8), 127, %v185_v2  ;;  %s216_s6 = scalar_lea.sflag (%p172_p8), [#allocation7], %s166_s5  ;;  %s409_s12 = scalar_lea.vmem (%p172_p8), %s633_s22, 128 }
  0x49   : > { %p410_p9 = scmp.ne.s32.totalorder (%p172_p8), %s633_s22, %s409_s12  ;;  %p692_p12 = scmp.ne.s32.totalorder (%p172_p8), %s685_s8, 0 }
  0x4a   : >> { %s178_s15 = scalar_lea.vmem [#allocation5], %s177_s14  ;;  %vm187_vm0 = vcmp.lt.s32.totalorder (%p172_p8), %v186_v3, 32  ;;  %s491_s0 = smov (%p172_p8), [#allocation8]  }
  0x4b   : >> { %v179_v0 = vld [vmem:[%s178_s15] sm:$0x1]  ;;  %p411_p13 = pnand (%p172_p8), %p410_p9, %p692_p12  ;;  %s413_s10 = sshll.u32 (%p172_p8), %s491_s0, 4  ;;  %s414_s10 = int_to_ptr.vmem [resolvable:$false] %s413_s10 }
  0x4c   : >> { %181 = vst [vmem:[%s180_s16] sm:$0x1] %v179_v0  ;;  %s415_s14 = scalar_lea.vmem (%p172_p8), %s414_s10, 256  ;;  %p416_p5 = scmp.lt.s32.totalorder (%p172_p8), %s633_s22, %s414_s10 }
  0x4d   : > { %p412_p1 = pneg (%p172_p8), %p411_p13  ;;  %p417_p6 = scmp.lt.s32.totalorder (%p172_p8), %s415_s14, %s409_s12 }
  0x4f   : > { %p418_p7 = por %p417_p6, %p416_p5 }
  0x51   : > { %p419_p10 = pnand %p418_p7, %p412_p1 }
  0x53   : > { %v182_v1 = vld [vmem:[#allocation2] sm:$0xff] }
  0x54   : > { %188 = vadd.xlane.f32.xlu0 %v182_v1 }
  0xe1   : > { %v189_v4 = vpop.xlane.xlu0 %188 }
  0xe2   : > { %v190_v5 = vmul.f32 0.03125, %v189_v4 }
  0xe4   : > { %v191_v6 = vsub.f32 %v182_v1, %v190_v5 }
  0xe6   : > { %v192_v7 = vsel %vm187_vm0, %v191_v6, 0.0 }
  0xe7   : > { %v193_v8 = vmul.f32 %v192_v7, %v192_v7 }
  0xe9   : > { %194 = vadd.xlane.f32.xlu0 %v193_v8 }
 0x176   : > { %v195_v9 = vpop.xlane.xlu0 %194 }
 0x177   : > { %v196_v10 = vmul.f32 0.03125, %v195_v9 }
 0x179   : > { %v197_v11 = vadd.f32 1e-05, %v196_v10 }
 0x17b   : > { %369 = vrsqrt.f32 %v197_v11 }
 0x185   : > { %v370_v12 = vpop.eup %369 }
 0x186   : > { %v199_v14 = vmul.f32 %v370_v12, %v192_v7 }
 0x188   : > { %v206_v16 = vmul.f32 %v302_v13, %v199_v14 }
 0x18a   : > { %v213_v17 = vadd.f32 %v303_v15, %v206_v16 }
 0x18c   : > { %214 = vst [vmem:[%s168_s13] sm:$0xff] %v213_v17 }
 0x18d   : > { %422 = shalt.err (!%p419_p10)
}
 0x18e   : > { %s423_s5 = scalar_lea.hbm %s631_s29, 128  ;;  %s427_s15 = scalar_lea.hbm %s681_s4, 256 }
 0x18f   : > { %p424_p11 = scmp.ne.s32.totalorder %s631_s29, %s423_s5  ;;  %p428_p4 = scmp.lt.u32.totalorder %s631_s29, %s681_s4 }
 0x190   : > { %p429_p3 = scmp.lt.u32.totalorder %s427_s15, %s423_s5  ;;  %p431_p9 = scmp.lt.u32.totalorder %s423_s5, %s631_s29 }
 0x191   : > { %p425_p0 = pnand %p424_p11, %p692_p12 }
 0x192   : > { %p430_p8 = por %p429_p3, %p428_p4 }
 0x193   : > { %p426_p2 = pneg %p425_p0 }
 0x194   : > { %p432_p13 = por %p431_p9, %p430_p8 }
 0x196   : > { %p433_p1 = pnand %p432_p13, %p426_p2 }
 0x198   : > { %436 = shalt.err (!%p433_p1)
}
 0x199   : > { %312 = dma.vmem_to_hbm [thread:$0]  (%p692_p12), %s633_s22, 128, %s631_s29, %s216_s6  }
 0x19a PF: > { %p324_p5 = scmp.ge.s32.totalorder %s481_s28, 2  ;;  %s241_s18 = sand.u32 1, %s469_s25  }
 0x19b   : > { %p693_p6 = scmp.ne.s32.totalorder %s686_s9, 0  ;;  %s242_s19 = scalar_lea.sflag [#allocation7], %s241_s18 }
 0x19d   : > { %p319_p7 = pnand %p324_p5, %p693_p6 }
 0x19f   : > { %464 = dma.done.wait (!%p319_p7), %s242_s19, 128  }
 0x1a0   : > { %466 = vsyncadd (!%p319_p7), %s242_s19, 4294967168  ;;  %p19_p10 = scmp.ge.s32.totalorder %s554_s30, 4   ;;  %s694_s25 = smov %s473_s26 }
 0x1a1   : > { %s695_s26 = smov %s477_s27  ;;  %s696_s27 = smov %s565_s7 }
 0x1a2   : > { %s697_s28 = smov %s554_s30  ;;  %21 = sbr.rel (!%p19_p10) target bundleno = 16 (0x10), region = 89 }
 0x1a9   :  { %247 = vsyncpa [#allocation6], 1 }
 0x1aa   :  { %249 = vsyncpa [#allocation6 + $0x1], 1 }
 0x1ab   :  { %250 = vsyncpa [#allocation7], 1 }
 0x1ac   :  { %252 = vsyncpa [#allocation7 + $0x1], 1 }

</bundles_post_ra>
